<compile_context>
chip_gen: v7x
topology: tpu7x:2x2x1
jax: 0.10.0
libtpu: 0.0.40
codegen_flags: <defaults>
</compile_context>

<pallas_src>
import functools

import jax
import jax.numpy as jnp
from jax.experimental import pallas as pl
from jax.experimental.pallas import tpu as pltpu

# Pendulum-v0: state_dim = 3, action_dim = 1
STATE_DIM = 3
ACTION_DIM = 1
IN_DIM = STATE_DIM + ACTION_DIM   # 4
H1 = 100          # fc1 out features (logical)
H2 = 20           # fc2 out features (logical)
OUT = 1
H1P = 128         # fc1 padded to a full 128-lane/sublane tile
H2P = 128         # fc2 padded


def _round_up(x, m):
    return ((x + m - 1) // m) * m


def critic_kernel(xT_ref, w1_ref, b1_ref, w2_ref, b2_ref, w3_ref, b3_ref, o_ref):
    """One batch tile, transposed layout (features on sublanes, batch on lanes).

    xT_ref : (IN_DIM, TB) f32   -- fused [state; action], streamed per tile
    w1     : (H1P, IN_DIM) f32    b1 : (H1P, 1) f32
    w2     : (H2P, H1P)   bf16    b2 : (H2P, 1) f32
    w3     : (H2P, 1)      f32    b3 : (1, 1)   f32
    o_ref  : (1, TB)       f32  -- lane-dense Q row
    """
    # fc1: single K=4 MXU dot (concat already fused into the streamed strip).
    h1 = jnp.dot(w1_ref[...], xT_ref[...], preferred_element_type=jnp.float32)
    h1 = jnp.maximum(h1 + b1_ref[...], 0.0)                          # (H1P, TB) f32

    # fc2: dominant FLOPs -> bf16 operands on the MXU, f32 accumulation.
    # Elementwise (bias, relu) stays f32 (v5e VPU has no bf16 support).
    h2 = jnp.dot(w2_ref[...], h1.astype(jnp.bfloat16),
                 preferred_element_type=jnp.float32)
    h2 = jnp.maximum(h2 + b2_ref[...], 0.0)                          # (H2P, TB) f32

    # fc3 (20 -> 1): VPU multiply + cross-sublane reduction; result is lane-dense.
    q = jnp.sum(h2 * w3_ref[...], axis=0, keepdims=True) + b3_ref[...]
    o_ref[...] = q.astype(o_ref.dtype)                               # (1, TB)


@functools.partial(jax.jit, static_argnames=("tb",))
def critic_forward(states, actions, packed_params, *, tb=2048):
    """states: (B, 3), actions: (B, 1)  ->  Q: (B, 1)."""
    w1p, b1p, w2p, b2p, w3c, b3p = packed_params
    B = states.shape[0]

    # Batch tile on the lane axis: a large multiple of 128 (amortizes the
    # per-grid-step overhead), clipped so the grid has >= 2 steps whenever
    # B_pad >= 256 (so both v7x TensorCores get work; harmless on v5e/v6e).
    tb_cap = _round_up(tb, 128)
    b128 = _round_up(B, 128)
    if b128 >= 256:
        TB = min(tb_cap, max(128, (b128 // 2) // 128 * 128))
    else:
        TB = min(tb_cap, b128)
    B_pad = _round_up(B, TB)
    pad = B_pad - B

    # Layout plumbing (fused under jit): fuse the concat, zero-pad the batch,
    # and transpose so batch sits on lanes inside the kernel.
    x = jnp.concatenate([states, actions], axis=1).astype(jnp.float32)   # (B, 4)
    xT = jnp.pad(x, ((0, pad), (0, 0))).T                                # (4, B_pad)

    # Constant index maps keep weights/biases VMEM-resident across the grid.
    resident = lambda a: pl.BlockSpec(a.shape, lambda i: (0,) * a.ndim)

    qT = pl.pallas_call(
        critic_kernel,
        out_shape=jax.ShapeDtypeStruct((1, B_pad), jnp.float32),
        grid=(pl.cdiv(B_pad, TB),),
        in_specs=[
            pl.BlockSpec((IN_DIM, TB), lambda i: (0, i)),   # streamed per tile
            resident(w1p), resident(b1p),                   # VMEM-resident weights
            resident(w2p), resident(b2p),
            resident(w3c), resident(b3p),
        ],
        out_specs=pl.BlockSpec((1, TB), lambda i: (0, i)),  # lane-dense store
        compiler_params=pltpu.CompilerParams(
            dimension_semantics=("parallel",)),             # megacore on v7x
    )(xT, w1p, b1p, w2p, b2p, w3c, b3p)

    return qT[0, :B].reshape(B, OUT)


def init_params(key):
    """Matches Critic.init_weight(): xavier_normal_ weights, zero biases.
    Logical shapes, PyTorch orientation (out_features, in_features)."""
    def xavier_normal(k, out_d, in_d):
        std = jnp.sqrt(2.0 / (in_d + out_d)).astype(jnp.float32)
        return std * jax.random.normal(k, (out_d, in_d), dtype=jnp.float32)

    k1, k2, k3 = jax.random.split(key, 3)
    w1 = xavier_normal(k1, H1, IN_DIM)        # (100, 4)
    b1 = jnp.zeros((H1,), jnp.float32)
    w2 = xavier_normal(k2, H2, H1)            # (20, 100)
    b2 = jnp.zeros((H2,), jnp.float32)
    w3 = xavier_normal(k3, OUT, H2)           # (1, 20)
    b3 = jnp.zeros((OUT,), jnp.float32)
    return (w1, b1, w2, b2, w3, b3)


def pack_params(params):
    """Zero-pad hidden dims to 128; w2 stored as bf16 for the MXU fc2 dot.

    Padded rows/columns are exactly zero (also exactly representable in bf16),
    so relu(0 + 0) = 0 keeps them inert: the padded network computes the same
    Q values as the logical one.
    """
    w1, b1, w2, b2, w3, b3 = params
    w1p = jnp.zeros((H1P, IN_DIM), jnp.float32).at[:H1, :].set(w1)       # (128, 4)
    b1p = jnp.zeros((H1P, 1), jnp.float32).at[:H1, 0].set(b1)
    w2p = (jnp.zeros((H2P, H1P), jnp.float32).at[:H2, :H1].set(w2)
           .astype(jnp.bfloat16))                                        # (128, 128) bf16
    b2p = jnp.zeros((H2P, 1), jnp.float32).at[:H2, 0].set(b2)
    w3c = jnp.zeros((H2P, 1), jnp.float32).at[:H2, 0].set(w3[0, :])
    b3p = b3.reshape(1, 1)
    return (w1p, b1p, w2p, b2p, w3c, b3p)


if __name__ == "__main__":
    root = jax.random.PRNGKey(0)
    kp, kd = jax.random.split(root)

    params = init_params(kp)        # logical (unpadded) parameters
    packed = pack_params(params)    # padded / bf16-fc2 kernel layout

    hp = jax.lax.Precision.HIGHEST

    def reference_f32(states, actions):
        w1, b1, w2, b2, w3, b3 = params
        x = jnp.concatenate([states, actions], axis=1)
        h1 = jnp.maximum(jnp.dot(x, w1.T, precision=hp) + b1, 0.0)
        h2 = jnp.maximum(jnp.dot(h1, w2.T, precision=hp) + b2, 0.0)
        return jnp.dot(h2, w3.T, precision=hp) + b3

    def reference_bf16_fc2(states, actions):
        # Mirrors the kernel's numerics: fc2 operands bf16, f32 accumulation.
        w1, b1, w2, b2, w3, b3 = params
        x = jnp.concatenate([states, actions], axis=1)
        h1 = jnp.maximum(jnp.dot(x, w1.T, precision=hp) + b1, 0.0)
        h2 = jnp.dot(h1.astype(jnp.bfloat16), w2.astype(jnp.bfloat16).T,
                     preferred_element_type=jnp.float32)
        h2 = jnp.maximum(h2 + b2, 0.0)
        return jnp.dot(h2, w3.T, precision=hp) + b3

    def run_and_check(B, tb):
        ks, ka = jax.random.split(jax.random.fold_in(kd, B))
        states = jax.random.normal(ks, (B, STATE_DIM), dtype=jnp.float32)
        actions = jax.random.normal(ka, (B, ACTION_DIM), dtype=jnp.float32)
        q = jax.block_until_ready(critic_forward(states, actions, packed, tb=tb))
        assert q.shape == (B, OUT)
        # Tight check vs. a reference with the same bf16-fc2 numerics.
        ref_m = reference_bf16_fc2(states, actions)
        assert jnp.allclose(q, ref_m, atol=5e-4, rtol=5e-4), \
            ("bf16-matched ref mismatch", float(jnp.max(jnp.abs(q - ref_m))))
        # Loose check vs. the full-f32 PyTorch-equivalent forward.
        ref_f = reference_f32(states, actions)
        assert jnp.allclose(q, ref_f, atol=5e-2, rtol=5e-2), \
            ("f32 ref mismatch", float(jnp.max(jnp.abs(q - ref_f))))

    run_and_check(8, 2048)    # small batch: single 128-lane tile, 1 grid step
    run_and_check(200, 2048)  # B_pad=256 -> TB clipped to 128 -> 2 grid steps

    print("KERNEL_OK")
</pallas_src>

<mosaic_0001>
module attributes {stable_mosaic.version = 11 : i64} {
  func.func @critic_kernel(%arg0: i32, %arg1: memref<4x128xf32, #tpu.memory_space<vmem>>, %arg2: memref<128x4xf32, #tpu.memory_space<vmem>>, %arg3: memref<128x1xf32, #tpu.memory_space<vmem>>, %arg4: memref<128x128xbf16, #tpu.memory_space<vmem>>, %arg5: memref<128x1xf32, #tpu.memory_space<vmem>>, %arg6: memref<128x1xf32, #tpu.memory_space<vmem>>, %arg7: memref<1x1xf32, #tpu.memory_space<vmem>>, %arg8: memref<1x128xf32, #tpu.memory_space<vmem>>) attributes {dimension_semantics = [#tpu.dimension_semantics<parallel>], iteration_bounds = array<i64: 1>, scalar_prefetch = 0 : i64, scratch_operands = 0 : i64, tpu.core_type = #tpu.core_type<tc>, window_params = [{transform_indices = @transform_0, window_bounds = array<i64: 4, 128>}, {pipeline_mode = #tpu.pipeline_mode<synchronous>, transform_indices = @transform_1, window_bounds = array<i64: 128, 4>}, {pipeline_mode = #tpu.pipeline_mode<synchronous>, transform_indices = @transform_2, window_bounds = array<i64: 128, 1>}, {pipeline_mode = #tpu.pipeline_mode<synchronous>, transform_indices = @transform_3, window_bounds = array<i64: 128, 128>}, {pipeline_mode = #tpu.pipeline_mode<synchronous>, transform_indices = @transform_4, window_bounds = array<i64: 128, 1>}, {pipeline_mode = #tpu.pipeline_mode<synchronous>, transform_indices = @transform_5, window_bounds = array<i64: 128, 1>}, {pipeline_mode = #tpu.pipeline_mode<synchronous>, transform_indices = @transform_6, window_bounds = array<i64: 1, 1>}, {transform_indices = @transform_7, window_bounds = array<i64: 1, 128>}]} {
    %c0 = arith.constant 0 : index
    %c0_0 = arith.constant 0 : index
    %0 = vector.load %arg2[%c0, %c0_0] : memref<128x4xf32, #tpu.memory_space<vmem>>, vector<128x4xf32>
    %c0_1 = arith.constant 0 : index
    %c0_2 = arith.constant 0 : index
    %1 = vector.load %arg1[%c0_1, %c0_2] : memref<4x128xf32, #tpu.memory_space<vmem>>, vector<4x128xf32>
    %cst = arith.constant dense<0.000000e+00> : vector<128x128xf32>
    %2 = tpu.matmul %0, %1, %cst {dimension_numbers = #tpu.dot_dimension_numbers<[1], [0], [0], [1], [0, 0, 1, 1], [], []>} : vector<128x4xf32>, vector<4x128xf32>, vector<128x128xf32> -> vector<128x128xf32>
    %c0_3 = arith.constant 0 : index
    %c0_4 = arith.constant 0 : index
    %3 = vector.load %arg3[%c0_3, %c0_4] : memref<128x1xf32, #tpu.memory_space<vmem>>, vector<128x1xf32>
    %4 = vector.broadcast %3 : vector<128x1xf32> to vector<128x128xf32>
    %5 = arith.addf %2, %4 : vector<128x128xf32>
    %cst_5 = arith.constant 0.000000e+00 : f32
    %6 = vector.broadcast %cst_5 : f32 to vector<128x128xf32>
    %7 = arith.maximumf %5, %6 : vector<128x128xf32>
    %c0_6 = arith.constant 0 : index
    %c0_7 = arith.constant 0 : index
    %8 = vector.load %arg4[%c0_6, %c0_7] : memref<128x128xbf16, #tpu.memory_space<vmem>>, vector<128x128xbf16>
    %9 = arith.truncf %7 : vector<128x128xf32> to vector<128x128xbf16>
    %cst_8 = arith.constant dense<0.000000e+00> : vector<128x128xf32>
    %10 = tpu.matmul %8, %9, %cst_8 {dimension_numbers = #tpu.dot_dimension_numbers<[1], [0], [0], [1], [0, 0, 1, 1], [], []>} : vector<128x128xbf16>, vector<128x128xbf16>, vector<128x128xf32> -> vector<128x128xf32>
    %c0_9 = arith.constant 0 : index
    %c0_10 = arith.constant 0 : index
    %11 = vector.load %arg5[%c0_9, %c0_10] : memref<128x1xf32, #tpu.memory_space<vmem>>, vector<128x1xf32>
    %12 = vector.broadcast %11 : vector<128x1xf32> to vector<128x128xf32>
    %13 = arith.addf %10, %12 : vector<128x128xf32>
    %cst_11 = arith.constant 0.000000e+00 : f32
    %14 = vector.broadcast %cst_11 : f32 to vector<128x128xf32>
    %15 = arith.maximumf %13, %14 : vector<128x128xf32>
    %c0_12 = arith.constant 0 : index
    %c0_13 = arith.constant 0 : index
    %16 = vector.load %arg6[%c0_12, %c0_13] : memref<128x1xf32, #tpu.memory_space<vmem>>, vector<128x1xf32>
    %17 = vector.broadcast %16 : vector<128x1xf32> to vector<128x128xf32>
    %18 = arith.mulf %15, %17 : vector<128x128xf32>
    %cst_14 = arith.constant dense<0.000000e+00> : vector<128xf32>
    %19 = vector.multi_reduction <add>, %18, %cst_14 [0] : vector<128x128xf32> to vector<128xf32>
    %20 = vector.shape_cast %19 : vector<128xf32> to vector<1x128xf32>
    %c0_15 = arith.constant 0 : index
    %c0_16 = arith.constant 0 : index
    %21 = vector.load %arg7[%c0_15, %c0_16] : memref<1x1xf32, #tpu.memory_space<vmem>>, vector<1x1xf32>
    %22 = vector.broadcast %21 : vector<1x1xf32> to vector<1x128xf32>
    %23 = arith.addf %20, %22 : vector<1x128xf32>
    %c0_17 = arith.constant 0 : index
    %c0_18 = arith.constant 0 : index
    %24 = vector.load %arg8[%c0_17, %c0_18] : memref<1x128xf32, #tpu.memory_space<vmem>>, vector<1x128xf32>
    tpu.vector_store %arg8[%c0_17, %c0_18], %23 {strides = array<i32>} : memref<1x128xf32, #tpu.memory_space<vmem>>, vector<1x128xf32>,
    return
  }
  func.func @transform_0(%arg0: i32) -> (i32, i32) {
    %c0_i32 = arith.constant 0 : i32
    %c0_i32_0 = arith.constant 0 : i32
    return %c0_i32, %arg0 : i32, i32
  }
  func.func @transform_1(%arg0: i32) -> (i32, i32) {
    %c0_i32 = arith.constant 0 : i32
    %c0_i32_0 = arith.constant 0 : i32
    %c0_i32_1 = arith.constant 0 : i32
    return %c0_i32, %c0_i32_0 : i32, i32
  }
  func.func @transform_2(%arg0: i32) -> (i32, i32) {
    %c0_i32 = arith.constant 0 : i32
    %c0_i32_0 = arith.constant 0 : i32
    %c0_i32_1 = arith.constant 0 : i32
    return %c0_i32, %c0_i32_0 : i32, i32
  }
  func.func @transform_3(%arg0: i32) -> (i32, i32) {
    %c0_i32 = arith.constant 0 : i32
    %c0_i32_0 = arith.constant 0 : i32
    %c0_i32_1 = arith.constant 0 : i32
    return %c0_i32, %c0_i32_0 : i32, i32
  }
  func.func @transform_4(%arg0: i32) -> (i32, i32) {
    %c0_i32 = arith.constant 0 : i32
    %c0_i32_0 = arith.constant 0 : i32
    %c0_i32_1 = arith.constant 0 : i32
    return %c0_i32, %c0_i32_0 : i32, i32
  }
  func.func @transform_5(%arg0: i32) -> (i32, i32) {
    %c0_i32 = arith.constant 0 : i32
    %c0_i32_0 = arith.constant 0 : i32
    %c0_i32_1 = arith.constant 0 : i32
    return %c0_i32, %c0_i32_0 : i32, i32
  }
  func.func @transform_6(%arg0: i32) -> (i32, i32) {
    %c0_i32 = arith.constant 0 : i32
    %c0_i32_0 = arith.constant 0 : i32
    %c0_i32_1 = arith.constant 0 : i32
    return %c0_i32, %c0_i32_0 : i32, i32
  }
  func.func @transform_7(%arg0: i32) -> (i32, i32) {
    %c0_i32 = arith.constant 0 : i32
    %c0_i32_0 = arith.constant 0 : i32
    return %c0_i32, %arg0 : i32, i32
  }
}

</mosaic_0001>

<bundles_post_ra>
// kernel: critic_forward.1
= control target key start
LH: loop header
LB: loop body
LE: loop exit
PB: predicated region body
PF: predicated region fallthrough
CT: control target
= control target key end

     0   :  { %vm191_vm0 = vcmask 1043456   ;;  %vm142_vm1 = vcmask 31744   ;;  %v929_v0 = vmov 0   ;;  %s1213_s2 = inlined_call_operand.vmem [shape: f32[128,1], index: 2, kind: input, shape index: {}]   ;;  %s1214_s0 = inlined_call_operand.vmem [shape: f32[4,128], index: 0, kind: input, shape index: {}]   ;;  %s1215_s1 = inlined_call_operand.vmem [shape: f32[128,4], index: 1, kind: input, shape index: {}]   ;;  %s1216_s6 = inlined_call_operand.<no memory space> [shape: f32[1,1], index: 6, kind: input, shape index: {}]   ;;  %s1217_s4 = inlined_call_operand.vmem [shape: f32[128,1], index: 4, kind: input, shape index: {}]   ;;  %s1218_s5 = inlined_call_operand.vmem [shape: f32[128,1], index: 5, kind: input, shape index: {}]   ;;  %s1219_s3 = inlined_call_operand.vmem [shape: bf16[128,128], index: 3, kind: input, shape index: {}]   ;;  %s1220_s7 = inlined_call_operand.vmem [shape: f32[1,128], index: 7, kind: output, shape index: {}]  }
   0x1   :  { %920 = vset.pattern.permute.xlu1 %v929_v0  ;;  %919 = vset.pattern.permute.xlu0 %v929_v0  ;;  %v48_v1 = vld [vmem:[%s1213_s2 + $0x10] sm:$0xff]  ;;  %v46_v2 = vld [vmem:[%s1213_s2] sm:$0xff]  ;;  %v12_v4 = vstv %s1216_s6  ;;  %v30_v6 = vld [vmem:[%s1215_s1 + $0x8] sm:$0xff] }
   0x2   :  { %v45_v3 = vld [vmem:[%s1214_s0] sm:$0xf]  ;;  %74 = vperm.xlu1 %920, %v48_v1   ;;  %64 = vperm.xlu0 %919, %v46_v2   ;;  %13 = vst [vmem:[#allocation2] sm:$0x1] %v12_v4  ;;  %v49_v7 = vld [vmem:[%s1213_s2 + $0x18] sm:$0xff]  ;;  %v47_v8 = vld [vmem:[%s1213_s2 + $0x8] sm:$0xff] }
   0x3   :  { %v29_v5 = vld [vmem:[%s1215_s1] sm:$0xff]  ;;  %844 = vmatprep.subr.msk.mxu0 %vm191_vm0, %v45_v3  ;;  %v31_v9 = vld [vmem:[%s1215_s1 + $0x10] sm:$0xff]  ;;  %v32_v10 = vld [vmem:[%s1215_s1 + $0x18] sm:$0xff] }
   0x4   :  { %846 = vmatprep.mubr.msk.f32.mxu0 %vm142_vm1, %v29_v5  ;;  %845 = vmatpush3.msk.msra.mxu0 %vm191_vm0, %v45_v3  ;;  %v51_v11 = vld [vmem:[%s1213_s2 + $0x28] sm:$0xff]  ;;  %v50_v12 = vld [vmem:[%s1213_s2 + $0x20] sm:$0xff]  ;;  %v53_v15 = vld [vmem:[%s1213_s2 + $0x38] sm:$0xff] }
   0x5   :  { %847 = vmatmul.mubr.msk.f32.vlgmr.msra.gmra.mrb[0].mxu0 %vm142_vm1, %v30_v6  ;;  %v33_v13 = vld [vmem:[%s1215_s1 + $0x20] sm:$0xff]  ;;  %v34_v14 = vld [vmem:[%s1215_s1 + $0x28] sm:$0xff]  ;;  %v52_v16 = vld [vmem:[%s1213_s2 + $0x30] sm:$0xff] }
   0x6   :  { %79 = vperm.xlu1 %920, %v49_v7   ;;  %69 = vperm.xlu0 %919, %v47_v8   ;;  %v35_v17 = vld [vmem:[%s1215_s1 + $0x30] sm:$0xff]  ;;  %v36_v18 = vld [vmem:[%s1215_s1 + $0x38] sm:$0xff]  ;;  %v55_v19 = vld [vmem:[%s1213_s2 + $0x48] sm:$0xff] }
   0x7   :  { %849 = vmatprep.mubr.msk.f32.mxu0 %vm142_vm1, %v31_v9  ;;  %v54_v20 = vld [vmem:[%s1213_s2 + $0x40] sm:$0xff]  ;;  %v38_v22 = vld [vmem:[%s1215_s1 + $0x48] sm:$0xff]  ;;  %v57_v23 = vld [vmem:[%s1213_s2 + $0x58] sm:$0xff] }
   0x8   :  { %v37_v21 = vld [vmem:[%s1215_s1 + $0x40] sm:$0xff]  ;;  %v56_v24 = vld [vmem:[%s1213_s2 + $0x50] sm:$0xff]  ;;  %v40_v26 = vld [vmem:[%s1215_s1 + $0x58] sm:$0xff] }
   0x9   :  { %850 = vmatmul.mubr.msk.f32.gmra.mrb[2].mxu0 %vm142_vm1, %v32_v10  ;;  %v39_v25 = vld [vmem:[%s1215_s1 + $0x50] sm:$0xff]  ;;  %v59_v27 = vld [vmem:[%s1213_s2 + $0x68] sm:$0xff]  ;;  %v58_v28 = vld [vmem:[%s1213_s2 + $0x60] sm:$0xff] }
   0xa   :  { %89 = vperm.xlu1 %920, %v51_v11   ;;  %84 = vperm.xlu0 %919, %v50_v12   ;;  %v41_v29 = vld [vmem:[%s1215_s1 + $0x60] sm:$0xff]  ;;  %v42_v30 = vld [vmem:[%s1215_s1 + $0x68] sm:$0xff]  ;;  %v61_v31 = vld [vmem:[%s1213_s2 + $0x78] sm:$0xff] }
   0xb   :  { %852 = vmatprep.mubr.msk.f32.mxu0 %vm142_vm1, %v33_v13  ;;  %v60_v32 = vld [vmem:[%s1213_s2 + $0x70] sm:$0xff]  ;;  %v44_v34 = vld [vmem:[%s1215_s1 + $0x78] sm:$0xff]  ;;  %v381_v35 = vld [vmem:[%s1217_s4 + $0x8] sm:$0xff] }
   0xc   :  { %v43_v33 = vld [vmem:[%s1215_s1 + $0x70] sm:$0xff]  ;;  %v380_v36 = vld [vmem:[%s1217_s4] sm:$0xff]  ;;  %v383_v37 = vld [vmem:[%s1217_s4 + $0x18] sm:$0xff] }
   0xd   :  { %853 = vmatmul.mubr.msk.f32.gmra.mrb[4].mxu0 %vm142_vm1, %v34_v14  ;;  %v382_v38 = vld [vmem:[%s1217_s4 + $0x10] sm:$0xff]  ;;  %v385_v39 = vld [vmem:[%s1217_s4 + $0x28] sm:$0xff]  ;;  %v384_v40 = vld [vmem:[%s1217_s4 + $0x20] sm:$0xff] }
   0xe   :  { %99 = vperm.xlu1 %920, %v53_v15   ;;  %94 = vperm.xlu0 %919, %v52_v16   ;;  %v638_v41 = vld [vmem:[%s1218_s5 + $0x8] sm:$0xff]  ;;  %v637_v42 = vld [vmem:[%s1218_s5] sm:$0xff]  ;;  %v640_v43 = vld [vmem:[%s1218_s5 + $0x18] sm:$0xff] }
   0xf   :  { %855 = vmatprep.mubr.msk.f32.mxu0 %vm142_vm1, %v35_v17  ;;  %v639_v44 = vld [vmem:[%s1218_s5 + $0x10] sm:$0xff]  ;;  %v641_v45 = vld [vmem:[%s1218_s5 + $0x20] sm:$0xff]  ;;  %v642_v47 = vld [vmem:[%s1218_s5 + $0x28] sm:$0xff] }
  0x10   :  { %v386_v46 = vld [vmem:[%s1217_s4 + $0x30] sm:$0xff]  ;;  %v387_v48 = vld [vmem:[%s1217_s4 + $0x38] sm:$0xff]  ;;  %v388_v50 = vld [vmem:[%s1217_s4 + $0x40] sm:$0xff] }
  0x11   :  { %856 = vmatmul.mubr.msk.f32.gmra.mrb[6].mxu0 %vm142_vm1, %v36_v18  ;;  %v643_v49 = vld [vmem:[%s1218_s5 + $0x30] sm:$0xff]  ;;  %v644_v51 = vld [vmem:[%s1218_s5 + $0x38] sm:$0xff]  ;;  %v389_v52 = vld [vmem:[%s1217_s4 + $0x48] sm:$0xff] }
  0x12   :  { %109 = vperm.xlu1 %920, %v55_v19   ;;  %104 = vperm.xlu0 %919, %v54_v20   ;;  %v645_v53 = vld [vmem:[%s1218_s5 + $0x40] sm:$0xff]  ;;  %v390_v54 = vld [vmem:[%s1217_s4 + $0x50] sm:$0xff]  ;;  %v646_v55 = vld [vmem:[%s1218_s5 + $0x48] sm:$0xff] }
  0x13   :  { %858 = vmatprep.mubr.msk.f32.mxu0 %vm142_vm1, %v37_v21  ;;  %v391_v56 = vld [vmem:[%s1217_s4 + $0x58] sm:$0xff]  ;;  %v647_v57 = vld [vmem:[%s1218_s5 + $0x50] sm:$0xff]  ;;  %v392_v58 = vld [vmem:[%s1217_s4 + $0x60] sm:$0xff] }
  0x14   :  { %v648_v59 = vld [vmem:[%s1218_s5 + $0x58] sm:$0xff]  ;;  %v393_v60 = vld [vmem:[%s1217_s4 + $0x68] sm:$0xff]  ;;  %v649_v61 = vld [vmem:[%s1218_s5 + $0x60] sm:$0xff] }
  0x15   :  { %859 = vmatmul.mubr.msk.f32.gmra.mrb[8].mxu0 %vm142_vm1, %v38_v22  ;;  %v394_v62 = vld [vmem:[%s1217_s4 + $0x70] sm:$0xff]  ;;  %v650_v63 = vld [vmem:[%s1218_s5 + $0x68] sm:$0xff]  ;;  %v395_v0 = vld [vmem:[%s1217_s4 + $0x78] sm:$0xff] }
  0x16   :  { %119 = vperm.xlu1 %920, %v57_v23   ;;  %114 = vperm.xlu0 %919, %v56_v24   ;;  %v652_v1 = vld [vmem:[%s1218_s5 + $0x78] sm:$0xff]  ;;  %v651_v2 = vld [vmem:[%s1218_s5 + $0x70] sm:$0xff]  ;;  %v770_v3 = vld [vmem:[#allocation2] sm:$0x1] }
  0x17   :  { %861 = vmatprep.mubr.msk.f32.mxu0 %vm142_vm1, %v39_v25  ;;  %v921_v4 = vld [vmem:[%s1219_s3] sm:$0xff]   ;;  %v922_v5 = vld [vmem:[%s1219_s3 + $0x10] sm:$0xff]  }
  0x18   :  { %890 = vmatprep.mubr.bf16.mxu1 %v922_v5 }
  0x19   :  { %862 = vmatmul.mubr.msk.f32.gmra.mrb[10].mxu0 %vm142_vm1, %v40_v26 }
  0x1a   :  { %129 = vperm.xlu1 %920, %v59_v27   ;;  %124 = vperm.xlu0 %919, %v58_v28  }
  0x1b   :  { %864 = vmatprep.mubr.msk.f32.mxu0 %vm142_vm1, %v41_v29 }
  0x1d   :  { %865 = vmatmul.mubr.msk.f32.gmra.mrb[12].mxu0 %vm142_vm1, %v42_v30 }
  0x1e   :  { %139 = vperm.xlu1 %920, %v61_v31   ;;  %134 = vperm.xlu0 %919, %v60_v32  }
  0x1f   :  { %867 = vmatprep.mubr.msk.f32.mxu0 %vm142_vm1, %v43_v33 }
  0x21   :  { %868 = vmatmul.mubr.msk.f32.gmra.mrb[14].mxu0 %vm142_vm1, %v44_v34 }
  0x22   :  { %403 = vperm.xlu1 %920, %v381_v35   ;;  %398 = vperm.xlu0 %919, %v380_v36  }
  0x23   :  { %886 = vmatprep.mubr.bf16.mxu0 %v921_v4 }
  0x26   :  { %413 = vperm.xlu1 %920, %v383_v37   ;;  %408 = vperm.xlu0 %919, %v382_v38  }
  0x2a   :  { %423 = vperm.xlu1 %920, %v385_v39   ;;  %418 = vperm.xlu0 %919, %v384_v40  }
  0x2e   :  { %660 = vperm.xlu1 %920, %v638_v41   ;;  %655 = vperm.xlu0 %919, %v637_v42  }
  0x32   :  { %670 = vperm.xlu1 %920, %v640_v43   ;;  %665 = vperm.xlu0 %919, %v639_v44  }
  0x36   :  { %675 = vperm.xlu1 %920, %v641_v45   ;;  %428 = vperm.xlu0 %919, %v386_v46  }
  0x3a   :  { %680 = vperm.xlu1 %920, %v642_v47   ;;  %433 = vperm.xlu0 %919, %v387_v48  }
  0x3e   :  { %685 = vperm.xlu1 %920, %v643_v49   ;;  %438 = vperm.xlu0 %919, %v388_v50  }
  0x42   :  { %690 = vperm.xlu1 %920, %v644_v51   ;;  %443 = vperm.xlu0 %919, %v389_v52  }
  0x46   :  { %695 = vperm.xlu1 %920, %v645_v53   ;;  %448 = vperm.xlu0 %919, %v390_v54  }
  0x4a   :  { %700 = vperm.xlu1 %920, %v646_v55   ;;  %453 = vperm.xlu0 %919, %v391_v56  }
  0x4e   :  { %705 = vperm.xlu1 %920, %v647_v57   ;;  %458 = vperm.xlu0 %919, %v392_v58  }
  0x52   :  { %710 = vperm.xlu1 %920, %v648_v59   ;;  %463 = vperm.xlu0 %919, %v393_v60  }
  0x56   :  { %715 = vperm.xlu1 %920, %v649_v61   ;;  %468 = vperm.xlu0 %919, %v394_v62  }
  0x5a   :  { %720 = vperm.xlu1 %920, %v650_v63   ;;  %473 = vperm.xlu0 %919, %v395_v0  }
  0x5e   :  { %730 = vperm.xlu1 %920, %v652_v1   ;;  %725 = vperm.xlu0 %919, %v651_v2  }
  0x62   :  { %773 = vperm.xlu0 %919, %v770_v3  }
  0x81   :  { %v75_v6 = vpop.permute.xlu1 %74  ;;  %v65_v7 = vpop.permute.xlu0 %64 }
  0x85   :  { %v80_v8 = vpop.permute.xlu1 %79  ;;  %v70_v9 = vpop.permute.xlu0 %69 }
  0x89   :  { %v90_v10 = vpop.permute.xlu1 %89  ;;  %v85_v11 = vpop.permute.xlu0 %84 }
  0x8d   :  { %v100_v17 = vpop.permute.xlu1 %99  ;;  %v95_v20 = vpop.permute.xlu0 %94 }
  0x91   :  { %v110_v30 = vpop.permute.xlu1 %109  ;;  %v105_v33 = vpop.permute.xlu0 %104 }
  0x95   :  { %v120_v42 = vpop.permute.xlu1 %119  ;;  %v115_v45 = vpop.permute.xlu0 %114 }
  0x99   :  { %v130_v55 = vpop.permute.xlu1 %129  ;;  %v125_v58 = vpop.permute.xlu0 %124 }
  0x9d   :  { %v140_v3 = vpop.permute.xlu1 %139 }
  0xd8   :  { %v848_v12 = vpop.f32.mrb[0].mxu0 }
  0xd9   :  { %v267_v13 = vadd.f32 %v848_v12, %v70_v9  ;;  %v261_v14 = vpop.f32.mrb[1].mxu0 }
  0xda   :  { %v262_v15 = vadd.f32 %v261_v14, %v65_v7  ;;  %v923_v14 = vld [vmem:[%s1219_s3 + $0x8] sm:$0xff]  }
  0xdb   :  { %v341_v16 = vmax.f32 %v267_v13, 0.0 }
  0xdc   :  { %v340_v18 = vmax.f32 %v262_v15, 0.0  ;;  %v851_v19 = vpop.f32.mrb[2].mxu0  ;;  %v924_v15 = vld [vmem:[%s1219_s3 + $0x18] sm:$0xff]  }
  0xdd   :  { %v277_v21 = vadd.f32 %v851_v19, %v80_v8  ;;  %v271_v22 = vpop.f32.mrb[3].mxu0  ;;  %v928_v19 = vld [vmem:[%s1219_s3 + $0x38] sm:$0xff]  }
  0xde   :  { %v372_v23 = vpack.c.bf16 %v341_v16, %v340_v18  ;;  %v272_v24 = vadd.f32 %v271_v22, %v75_v6  ;;  %v135_v6 = vpop.permute.xlu0 %134  ;;  %v925_v16 = vld [vmem:[%s1219_s3 + $0x20] sm:$0xff]   ;;  %v927_v18 = vld [vmem:[%s1219_s3 + $0x30] sm:$0xff]  }
  0xdf   :  { %v343_v25 = vmax.f32 %v277_v21, 0.0  ;;  %v404_v21 = vpop.permute.xlu1 %403 }
  0xe0   :  { %v342_v26 = vmax.f32 %v272_v24, 0.0  ;;  %v854_v27 = vpop.f32.mrb[4].mxu0  ;;  %870 = vmatprep.subr.bf16.mxu0 %v372_v23  ;;  %902 = vmatprep.subr.bf16.mxu1 %v372_v23 }
  0xe1   :  { %v287_v28 = vadd.f32 %v854_v27, %v90_v10  ;;  %v281_v29 = vpop.f32.mrb[5].mxu0  ;;  %871 = vmatpush3.bf16.msra.mxu0 %v372_v23  ;;  %910 = vmatpush3.bf16.msra.mxu1 %v372_v23 }
  0xe2   :  { %v373_v31 = vpack.c.bf16 %v343_v25, %v342_v26  ;;  %v282_v32 = vadd.f32 %v281_v29, %v85_v11 }
  0xe3   :  { %v345_v34 = vmax.f32 %v287_v28, 0.0  ;;  %v414_v23 = vpop.permute.xlu1 %413 }
  0xe4   :  { %v344_v35 = vmax.f32 %v282_v32, 0.0  ;;  %v857_v36 = vpop.f32.mrb[6].mxu0  ;;  %872 = vmatprep.subr.bf16.mxu0 %v373_v31  ;;  %903 = vmatprep.subr.bf16.mxu1 %v373_v31 }
  0xe5   :  { %v297_v37 = vadd.f32 %v857_v36, %v100_v17  ;;  %v291_v38 = vpop.f32.mrb[7].mxu0  ;;  %873 = vmatpush3.bf16.msra.mxu0 %v373_v31  ;;  %911 = vmatpush3.bf16.msra.mxu1 %v373_v31  ;;  %v926_v17 = vld [vmem:[%s1219_s3 + $0x28] sm:$0xff]  }
  0xe6   :  { %v374_v39 = vpack.c.bf16 %v345_v34, %v344_v35  ;;  %v292_v40 = vadd.f32 %v291_v38, %v95_v20  ;;  %v399_v20 = vpop.permute.xlu0 %398 }
  0xe7   :  { %v347_v41 = vmax.f32 %v297_v37, 0.0  ;;  %v424_v25 = vpop.permute.xlu1 %423 }
  0xe8   :  { %v346_v43 = vmax.f32 %v292_v40, 0.0  ;;  %v860_v44 = vpop.f32.mrb[8].mxu0  ;;  %874 = vmatprep.subr.bf16.mxu0 %v374_v39  ;;  %904 = vmatprep.subr.bf16.mxu1 %v374_v39 }
  0xe9   :  { %v307_v46 = vadd.f32 %v860_v44, %v110_v30  ;;  %v301_v47 = vpop.f32.mrb[9].mxu0  ;;  %875 = vmatpush3.bf16.msra.mxu0 %v374_v39  ;;  %912 = vmatpush3.bf16.msra.mxu1 %v374_v39 }
  0xea   :  { %v375_v48 = vpack.c.bf16 %v347_v41, %v346_v43  ;;  %v302_v49 = vadd.f32 %v301_v47, %v105_v33  ;;  %v409_v22 = vpop.permute.xlu0 %408 }
  0xeb   :  { %v349_v50 = vmax.f32 %v307_v46, 0.0  ;;  %v661_v27 = vpop.permute.xlu1 %660 }
  0xec   :  { %v348_v51 = vmax.f32 %v302_v49, 0.0  ;;  %v863_v52 = vpop.f32.mrb[10].mxu0  ;;  %876 = vmatprep.subr.bf16.mxu0 %v375_v48  ;;  %905 = vmatprep.subr.bf16.mxu1 %v375_v48 }
  0xed   :  { %v317_v53 = vadd.f32 %v863_v52, %v120_v42  ;;  %v311_v54 = vpop.f32.mrb[11].mxu0  ;;  %877 = vmatpush3.bf16.msra.mxu0 %v375_v48  ;;  %913 = vmatpush3.bf16.msra.mxu1 %v375_v48 }
  0xee   :  { %v376_v56 = vpack.c.bf16 %v349_v50, %v348_v51  ;;  %v312_v57 = vadd.f32 %v311_v54, %v115_v45  ;;  %v419_v24 = vpop.permute.xlu0 %418 }
  0xef   :  { %v351_v59 = vmax.f32 %v317_v53, 0.0  ;;  %v671_v29 = vpop.permute.xlu1 %670 }
  0xf0   :  { %v350_v60 = vmax.f32 %v312_v57, 0.0  ;;  %v866_v61 = vpop.f32.mrb[12].mxu0  ;;  %878 = vmatprep.subr.bf16.mxu0 %v376_v56  ;;  %906 = vmatprep.subr.bf16.mxu1 %v376_v56 }
  0xf1   :  { %v327_v62 = vadd.f32 %v866_v61, %v130_v55  ;;  %v321_v63 = vpop.f32.mrb[13].mxu0  ;;  %879 = vmatpush3.bf16.msra.mxu0 %v376_v56  ;;  %914 = vmatpush3.bf16.msra.mxu1 %v376_v56 }
  0xf2   :  { %v377_v0 = vpack.c.bf16 %v351_v59, %v350_v60  ;;  %v322_v1 = vadd.f32 %v321_v63, %v125_v58  ;;  %v656_v26 = vpop.permute.xlu0 %655 }
  0xf3   :  { %v353_v2 = vmax.f32 %v327_v62, 0.0  ;;  %v676_v31 = vpop.permute.xlu1 %675 }
  0xf4   :  { %v352_v4 = vmax.f32 %v322_v1, 0.0  ;;  %v869_v5 = vpop.f32.mrb[14].mxu0  ;;  %880 = vmatprep.subr.bf16.mxu0 %v377_v0  ;;  %907 = vmatprep.subr.bf16.mxu1 %v377_v0 }
  0xf5   :  { %v337_v7 = vadd.f32 %v869_v5, %v140_v3  ;;  %v331_v8 = vpop.f32.mrb[15].mxu0  ;;  %881 = vmatpush3.bf16.msra.mxu0 %v377_v0  ;;  %915 = vmatpush3.bf16.msra.mxu1 %v377_v0 }
  0xf6   :  { %v378_v9 = vpack.c.bf16 %v353_v2, %v352_v4  ;;  %v332_v10 = vadd.f32 %v331_v8, %v135_v6  ;;  %v666_v28 = vpop.permute.xlu0 %665 }
  0xf7   :  { %v355_v11 = vmax.f32 %v337_v7, 0.0  ;;  %v681_v33 = vpop.permute.xlu1 %680 }
  0xf8   :  { %v354_v12 = vmax.f32 %v332_v10, 0.0  ;;  %882 = vmatprep.subr.bf16.mxu0 %v378_v9  ;;  %908 = vmatprep.subr.bf16.mxu1 %v378_v9 }
  0xf9   :  { %883 = vmatpush3.bf16.msra.mxu0 %v378_v9  ;;  %916 = vmatpush3.bf16.msra.mxu1 %v378_v9 }
  0xfa   :  { %v379_v13 = vpack.c.bf16 %v355_v11, %v354_v12  ;;  %v429_v30 = vpop.permute.xlu0 %428 }
  0xfb   :  { %v686_v35 = vpop.permute.xlu1 %685 }
  0xfc   :  { %884 = vmatprep.subr.bf16.mxu0 %v379_v13  ;;  %909 = vmatprep.subr.bf16.mxu1 %v379_v13 }
  0xfd   :  { %885 = vmatpush3.bf16.msra.mxu0 %v379_v13  ;;  %917 = vmatpush3.bf16.msra.mxu1 %v379_v13 }
  0xfe   :  { %v434_v32 = vpop.permute.xlu0 %433 }
  0xff   :  { %v691_v37 = vpop.permute.xlu1 %690 }
 0x100   :  { %887 = vmatmul.mubr.bf16.vlgmr.msra.gmra.mrb[16].mxu0 %v923_v14  ;;  %891 = vmatmul.mubr.bf16.vlgmr.msra.gmra.mrb[0].mxu1 %v924_v15 }
 0x101   :  { %894 = vmatprep.mubr.bf16.mxu1 %v925_v16 }
 0x102   :  { %v439_v34 = vpop.permute.xlu0 %438 }
 0x103   :  { %v696_v39 = vpop.permute.xlu1 %695 }
 0x106   :  { %v444_v36 = vpop.permute.xlu0 %443 }
 0x107   :  { %v701_v54 = vpop.permute.xlu1 %700 }
 0x108   :  { %895 = vmatmul.mubr.bf16.gmra.mrb[4].mxu1 %v926_v17 }
 0x109   :  { %898 = vmatprep.mubr.bf16.mxu1 %v927_v18 }
 0x10a   :  { %v449_v38 = vpop.permute.xlu0 %448 }
 0x10b   :  { %v706_v6 = vpop.permute.xlu1 %705 }
 0x10e   :  { %v454_v40 = vpop.permute.xlu0 %453 }
 0x110   :  { %899 = vmatmul.mubr.bf16.gmra.mrb[8].mxu1 %v928_v19 }
 0x112   :  { %v459_v63 = vpop.permute.xlu0 %458 }
 0x116   :  { %v464_v16 = vpop.permute.xlu0 %463 }
 0x1d3   :  { %v888_v41 = vpop.f32.mrb[16].mxu0  ;;  %v892_v42 = vpop.f32.mrb[0].mxu1 }
 0x1d4   :  { %v558_v43 = vpop.f32.mrb[17].mxu0  ;;  %v574_v44 = vpop.f32.mrb[1].mxu1  ;;  %v567_v45 = vadd.f32 %v888_v41, %v409_v22  ;;  %v583_v2 = vadd.f32 %v892_v42, %v429_v30 }
 0x1d5   :  { %v559_v46 = vadd.f32 %v558_v43, %v399_v20  ;;  %v889_v47 = vpop.f32.mrb[18].mxu0  ;;  %v893_v48 = vpop.f32.mrb[2].mxu1  ;;  %v575_v56 = vadd.f32 %v574_v44, %v419_v24 }
 0x1d6   :  { %v561_v49 = vpop.f32.mrb[19].mxu0  ;;  %v577_v50 = vpop.f32.mrb[3].mxu1  ;;  %v570_v52 = vadd.f32 %v889_v47, %v414_v23  ;;  %v623_v55 = vmax.f32 %v567_v45, 0.0  ;;  %v586_v9 = vadd.f32 %v893_v48, %v434_v32  ;;  %v627_v12 = vmax.f32 %v583_v2, 0.0 }
 0x1d7   :  { %v621_v51 = vmax.f32 %v559_v46, 0.0  ;;  %v562_v53 = vadd.f32 %v561_v49, %v404_v21  ;;  %v578_v61 = vadd.f32 %v577_v50, %v424_v25  ;;  %v625_v3 = vmax.f32 %v575_v56, 0.0  ;;  %v711_v22 = vpop.permute.xlu1 %710  ;;  %v469_v42 = vpop.permute.xlu0 %468 }
 0x1d8   :  { %v624_v59 = vmax.f32 %v570_v52, 0.0  ;;  %v735_v1 = vmul.f32 %v666_v28, %v623_v55  ;;  %v628_v17 = vmax.f32 %v586_v9, 0.0  ;;  %v739_v24 = vmul.f32 %v686_v35, %v627_v12 }
 0x1d9   :  { %v622_v57 = vmax.f32 %v562_v53, 0.0  ;;  %v733_v58 = vmul.f32 %v656_v26, %v621_v51  ;;  %v626_v11 = vmax.f32 %v578_v61, 0.0  ;;  %v737_v13 = vmul.f32 %v676_v31, %v625_v3 }
 0x1da   :  { %v736_v8 = vmul.f32 %v671_v29, %v624_v59  ;;  %v740_v30 = vmul.f32 %v691_v37, %v628_v17  ;;  %v776_v2 = vlaneseq }
 0x1db   :  { %v734_v60 = vmul.f32 %v661_v27, %v622_v57  ;;  %v896_v62 = vpop.f32.mrb[4].mxu1  ;;  %v738_v18 = vmul.f32 %v681_v33, %v626_v11  ;;  %v716_v45 = vpop.permute.xlu1 %715 }
 0x1dc   :  { %v590_v0 = vpop.f32.mrb[5].mxu1  ;;  %v599_v26 = vadd.f32 %v896_v62, %v449_v38  ;;  %v474_v51 = vpop.permute.xlu0 %473 }
 0x1dd   :  { %v749_v4 = vadd.f32 %v734_v60, %v733_v58  ;;  %v897_v5 = vpop.f32.mrb[6].mxu1  ;;  %v591_v15 = vadd.f32 %v590_v0, %v439_v34 }
 0x1de   :  { %v593_v7 = vpop.f32.mrb[7].mxu1  ;;  %v602_v41 = vadd.f32 %v897_v5, %v454_v40  ;;  %v631_v34 = vmax.f32 %v599_v26, 0.0  ;;  %v777_v5 = vshrl.u32 %v776_v2, 7 }
 0x1df   :  { %v750_v10 = vadd.f32 %v749_v4, %v735_v1  ;;  %v594_v20 = vadd.f32 %v593_v7, %v444_v36  ;;  %v629_v27 = vmax.f32 %v591_v15, 0.0  ;;  %v721_v55 = vpop.permute.xlu1 %720 }
 0x1e0   :  { %v632_v46 = vmax.f32 %v602_v41, 0.0  ;;  %v743_v35 = vmul.f32 %v706_v6, %v631_v34  ;;  %v726_v61 = vpop.permute.xlu0 %725 }
 0x1e1   :  { %v751_v14 = vadd.f32 %v750_v10, %v736_v8  ;;  %v630_v31 = vmax.f32 %v594_v20, 0.0  ;;  %v741_v43 = vmul.f32 %v696_v39, %v629_v27  ;;  %v778_v8 = vsub.s32 0, %v777_v5 }
 0x1e2   :  { %v744_v52 = vmul.f32 %v711_v22, %v632_v46 }
 0x1e3   :  { %v752_v19 = vadd.f32 %v751_v14, %v737_v13  ;;  %v900_v21 = vpop.f32.mrb[8].mxu1  ;;  %v742_v47 = vmul.f32 %v701_v54, %v630_v31 }
 0x1e4   :  { %v606_v23 = vpop.f32.mrb[9].mxu1  ;;  %v615_v38 = vadd.f32 %v900_v21, %v469_v42  ;;  %v774_v10 = vpop.permute.xlu0 %773 }
 0x1e5   :  { %v753_v25 = vadd.f32 %v752_v19, %v738_v18  ;;  %v901_v28 = vpop.f32.mrb[10].mxu1  ;;  %v607_v33 = vadd.f32 %v606_v23, %v459_v63  ;;  %v731_v63 = vpop.permute.xlu1 %730  ;;  %v779_v12 = vrot.slane %v774_v10, %v778_v8 }
 0x1e6   :  { %v609_v29 = vpop.f32.mrb[11].mxu1  ;;  %v618_v53 = vadd.f32 %v901_v28, %v474_v51  ;;  %v635_v56 = vmax.f32 %v615_v38, 0.0 }
 0x1e7   :  { %v754_v32 = vadd.f32 %v753_v25, %v739_v24  ;;  %v610_v48 = vadd.f32 %v609_v29, %v464_v16  ;;  %v633_v50 = vmax.f32 %v607_v33, 0.0 }
 0x1e8   :  { %v636_v59 = vmax.f32 %v618_v53, 0.0  ;;  %v747_v62 = vmul.f32 %v726_v61, %v635_v56 }
 0x1e9   :  { %v755_v44 = vadd.f32 %v754_v32, %v740_v30  ;;  %v634_v40 = vmax.f32 %v610_v48, 0.0  ;;  %v745_v57 = vmul.f32 %v716_v45, %v633_v50 }
 0x1ea   :  { %v748_v0 = vmul.f32 %v731_v63, %v636_v59 }
 0x1eb   :  { %v756_v36 = vadd.f32 %v755_v44, %v741_v43  ;;  %v746_v60 = vmul.f32 %v721_v55, %v634_v40 }
 0x1ed   :  { %v757_v49 = vadd.f32 %v756_v36, %v742_v47 }
 0x1ef   :  { %v758_v37 = vadd.f32 %v757_v49, %v743_v35 }
 0x1f1   :  { %v759_v39 = vadd.f32 %v758_v37, %v744_v52 }
 0x1f3   :  { %v760_v58 = vadd.f32 %v759_v39, %v745_v57 }
 0x1f5   :  { %v761_v54 = vadd.f32 %v760_v58, %v746_v60 }
 0x1f7   :  { %v762_v1 = vadd.f32 %v761_v54, %v747_v62 }
 0x1f9   :  { %v763_v3 = vadd.f32 %v762_v1, %v748_v0 }
 0x1fb   :  { %v764_v4 = vrot.slane %v763_v3, 4 }
 0x1fd   :  { %v765_v6 = vadd.f32 %v764_v4, %v763_v3 }
 0x1ff   :  { %v766_v7 = vrot.slane %v765_v6, 2 }
 0x201   :  { %v767_v9 = vadd.f32 %v766_v7, %v765_v6 }
 0x203   :  { %v768_v11 = vrot.slane %v767_v9, 1 }
 0x205   :  { %v769_v13 = vadd.f32 %v768_v11, %v767_v9 }
 0x207   :  { %v780_v14 = vadd.f32 %v779_v12, %v769_v13 }
 0x209   :  { %781 = vst [vmem:[%s1220_s7] sm:$0x1] %v780_v14 }

</bundles_post_ra>
